<compile_context>
chip_gen: v5e
topology: v5e:2x2
jax: 0.10.0
libtpu: 0.0.40
codegen_flags: <defaults>
</compile_context>

<pallas_src>
import functools

import jax
import jax.numpy as jnp
from jax import lax
from jax.experimental import pallas as pl
from jax.experimental.pallas import tpu as pltpu


def _round_up(x, m):
    return (x + m - 1) // m * m


def _pow_gamma(u, gamma):
    """(1 - pt) ** gamma, with integer gamma unrolled to multiplies (trace time)."""
    g = float(gamma)
    if g.is_integer() and 0.0 <= g <= 16.0:
        gi = int(g)
        if gi == 0:
            return jnp.ones_like(u)
        w = u
        for _ in range(gi - 1):
            w = w * u
        return w
    return u ** jnp.float32(g)


def _focal_kernel(x_ref, t_ref, out_ref, *, gamma):
    # x: (C, T)  classes on sublanes, pixels on lanes.  t: (1, T), -1 == padding.
    x = x_ref[0].astype(jnp.float32)
    t = t_ref[0]
    C, T = x.shape

    # log_softmax over classes (short sublane axis)
    m = jnp.max(x, axis=0, keepdims=True)                       # (1, T)
    e = jnp.exp(x - m)                                          # (C, T)
    lse = jnp.log(jnp.sum(e, axis=0, keepdims=True)) + m        # (1, T)
    logp = x - lse                                              # (C, T)

    # gather target-class log-prob via one-hot mask (padded lanes match nothing)
    cls = lax.broadcasted_iota(jnp.int32, (C, T), 0)
    onehot = cls == t                                           # (C, T)
    logpt = jnp.sum(jnp.where(onehot, logp, 0.0), axis=0, keepdims=True)  # (1, T)
    pt = jnp.exp(logpt)

    w = _pow_gamma(1.0 - pt, gamma)
    loss = -w * logpt                 # padded lanes: logpt == 0 -> loss == 0
    s = jnp.sum(loss)

    out_ref[...] = jnp.broadcast_to(s, (1, 128)).astype(jnp.float32)


def _focal_kernel_alpha(a_ref, x_ref, t_ref, out_ref, *, gamma):
    x = x_ref[0].astype(jnp.float32)
    t = t_ref[0]
    a = a_ref[...].astype(jnp.float32)                          # (A, 1)
    C, T = x.shape
    A = a.shape[0]

    m = jnp.max(x, axis=0, keepdims=True)
    e = jnp.exp(x - m)
    lse = jnp.log(jnp.sum(e, axis=0, keepdims=True)) + m
    logp = x - lse

    cls = lax.broadcasted_iota(jnp.int32, (C, T), 0)
    onehot = cls == t
    logpt = jnp.sum(jnp.where(onehot, logp, 0.0), axis=0, keepdims=True)
    pt = jnp.exp(logpt)                # pt computed BEFORE alpha (as in PyTorch)

    if A == C:
        # reuse the onehot mask for the alpha gather
        at = jnp.sum(jnp.where(onehot, a, 0.0), axis=0, keepdims=True)
    else:
        acls = lax.broadcasted_iota(jnp.int32, (A, T), 0)
        at = jnp.sum(jnp.where(acls == t, a, 0.0), axis=0, keepdims=True)
    logpt = logpt * at

    w = _pow_gamma(1.0 - pt, gamma)
    loss = -w * logpt                  # padded lanes: logpt == 0 and at == 0 -> 0
    s = jnp.sum(loss)

    out_ref[...] = jnp.broadcast_to(s, (1, 128)).astype(jnp.float32)


def focal_loss(logits, target, gamma=2.0, alpha=None, size_average=True):
    """Pallas implementation of FocalLoss.forward.

    logits: (B, C, H, W) float logits (any float dtype) or already-2D (N, C)
    target: (B, H, W) integer class indices (or (N,))
    alpha : None, python float/int, or list/tuple of per-class weights
    """
    # --- bring inputs to (B, C, HW) / (B, 1, HW): NO transpose for NCHW -------
    if logits.ndim > 2:
        B, C = logits.shape[0], logits.shape[1]
        x3 = logits.reshape(B, C, -1)                       # free reshape, no copy
        t3 = target.reshape(B, 1, -1).astype(jnp.int32)
    else:
        # plain (N, C) classification input: small, one transpose is acceptable
        C = logits.shape[1]
        B = 1
        x3 = logits.T[None]                                 # (1, C, N)
        t3 = target.reshape(1, 1, -1).astype(jnp.int32)
    HW = x3.shape[2]
    N = B * HW

    # --- alpha handling mirrors FocalLoss.__init__ ----------------------------
    alpha_col = None
    if isinstance(alpha, (float, int)) and not isinstance(alpha, bool):
        alpha_col = jnp.array([[float(alpha)], [1.0 - float(alpha)]], jnp.float32)
    elif isinstance(alpha, (list, tuple)):
        alpha_col = jnp.asarray(list(alpha), dtype=jnp.float32).reshape(-1, 1)

    # --- tiling: pixels on the lane axis, ~1 MiB logits block -----------------
    bytes_per_elem = 4
    budget_elems = (1 << 20) // bytes_per_elem // max(C, 1)   # ~1 MiB per x block
    max_tile = max(128, (budget_elems // 128) * 128)
    n_hw = -(-HW // max_tile)                                 # number of lane tiles
    tile_hw = _round_up(-(-HW // n_hw), 128)                  # multiple of 128
    HW_pad = n_hw * tile_hw

    if HW_pad != HW:
        # pad pixels; padded targets = -1 -> one-hot matches nothing -> zero loss
        x3 = jnp.pad(x3, ((0, 0), (0, 0), (0, HW_pad - HW)))
        t3 = jnp.pad(t3, ((0, 0), (0, 0), (0, HW_pad - HW)), constant_values=-1)

    x_spec = pl.BlockSpec((1, C, tile_hw), lambda b, i: (b, 0, i))
    t_spec = pl.BlockSpec((1, 1, tile_hw), lambda b, i: (b, 0, i))
    # one lane-dense (1,128) partial-sum block per grid cell
    out_spec = pl.BlockSpec((1, 128), lambda b, i: (0, b * n_hw + i))

    gamma = float(gamma)
    if alpha_col is None:
        kernel = functools.partial(_focal_kernel, gamma=gamma)
        in_specs = [x_spec, t_spec]
        args = (x3, t3)
    else:
        A = alpha_col.shape[0]
        a_spec = pl.BlockSpec((A, 1), lambda b, i: (0, 0))
        kernel = functools.partial(_focal_kernel_alpha, gamma=gamma)
        in_specs = [a_spec, x_spec, t_spec]
        args = (alpha_col, x3, t3)

    partials = pl.pallas_call(
        kernel,
        out_shape=jax.ShapeDtypeStruct((1, B * n_hw * 128), jnp.float32),
        grid_spec=pltpu.PrefetchScalarGridSpec(
            num_scalar_prefetch=0,
            grid=(B, n_hw),
            in_specs=in_specs,
            out_specs=out_spec,
        ),
        compiler_params=pltpu.CompilerParams(
            dimension_semantics=("parallel", "parallel"),
            vmem_limit_bytes=32 * 1024 * 1024,
        ),
    )(*args)

    total = jnp.sum(partials.reshape(B * n_hw, 128)[:, 0])
    if size_average:
        return total / jnp.float32(N)
    return total


# --- pure-JAX reference for verification (mirrors the PyTorch module) ---------
def focal_loss_ref(logits_nchw, target_nhw, gamma=2.0, alpha=None, size_average=True):
    B, C = logits_nchw.shape[0], logits_nchw.shape[1]
    x = logits_nchw.reshape(B, C, -1)
    x = jnp.transpose(x, (0, 2, 1)).reshape(-1, C).astype(jnp.float32)
    t = target_nhw.reshape(-1).astype(jnp.int32)
    logp = jax.nn.log_softmax(x, axis=1)
    logpt = jnp.take_along_axis(logp, t[:, None], axis=1)[:, 0]
    pt = jnp.exp(logpt)
    if isinstance(alpha, (float, int)) and not isinstance(alpha, bool):
        av = jnp.array([alpha, 1.0 - alpha], dtype=jnp.float32)
        logpt = logpt * av[t]
    elif isinstance(alpha, (list, tuple)):
        av = jnp.array(list(alpha), dtype=jnp.float32)
        logpt = logpt * av[t]
    loss = -((1.0 - pt) ** gamma) * logpt
    return loss.mean() if size_average else loss.sum()


if __name__ == "__main__":
    key = jax.random.PRNGKey(0)
    k1, k2, k3, k4 = jax.random.split(key, 4)

    B, C, H, W = 2, 4, 16, 16
    logits = jax.random.normal(k1, (B, C, H, W), dtype=jnp.float32)
    target = jax.random.randint(k2, (B, H, W), 0, C, dtype=jnp.int32)

    # default FocalLoss(): gamma=2, alpha=None, size_average=True
    out = focal_loss(logits, target, gamma=2.0, alpha=None, size_average=True)
    out = jax.block_until_ready(out)
    ref = focal_loss_ref(logits, target, gamma=2.0, alpha=None, size_average=True)
    assert jnp.allclose(out, ref, rtol=1e-5, atol=1e-6), (out, ref)

    # per-class alpha weights (A == C -> one-hot reuse path)
    alpha = [0.1, 0.2, 0.3, 0.4]
    out_a = focal_loss(logits, target, gamma=2.0, alpha=alpha, size_average=True)
    out_a = jax.block_until_ready(out_a)
    ref_a = focal_loss_ref(logits, target, gamma=2.0, alpha=alpha, size_average=True)
    assert jnp.allclose(out_a, ref_a, rtol=1e-5, atol=1e-6), (out_a, ref_a)

    # non-128-multiple spatial size exercises the pad + (-1)-target masking path
    Hb, Wb = 9, 9
    logits_b = jax.random.normal(k3, (B, C, Hb, Wb), dtype=jnp.float32)
    target_b = jax.random.randint(k4, (B, Hb, Wb), 0, C, dtype=jnp.int32)
    out_b = focal_loss(logits_b, target_b, gamma=2.0, alpha=None, size_average=True)
    out_b = jax.block_until_ready(out_b)
    ref_b = focal_loss_ref(logits_b, target_b, gamma=2.0, alpha=None, size_average=True)
    assert jnp.allclose(out_b, ref_b, rtol=1e-5, atol=1e-6), (out_b, ref_b)

    print("KERNEL_OK")
</pallas_src>

<mosaic_0001>
module attributes {stable_mosaic.version = 11 : i64} {
  func.func @_focal_kernel(%arg0: i32, %arg1: i32, %arg2: memref<1x4x256xf32, #tpu.memory_space<vmem>>, %arg3: memref<1x1x256xi32, #tpu.memory_space<vmem>>, %arg4: memref<1x128xf32, #tpu.memory_space<vmem>>) attributes {dimension_semantics = [#tpu.dimension_semantics<parallel>, #tpu.dimension_semantics<parallel>], iteration_bounds = array<i64: 2, 1>, scalar_prefetch = 0 : i64, scratch_operands = 0 : i64, tpu.core_type = #tpu.core_type<tc>, window_params = [{transform_indices = @transform_0, window_bounds = array<i64: 1, 4, 256>}, {transform_indices = @transform_1, window_bounds = array<i64: 1, 1, 256>}, {transform_indices = @transform_2, window_bounds = array<i64: 1, 128>}]} {
    %c0 = arith.constant 0 : index
    %c0_0 = arith.constant 0 : index
    %c0_1 = arith.constant 0 : index
    %0 = vector.load %arg2[%c0, %c0_0, %c0_1] : memref<1x4x256xf32, #tpu.memory_space<vmem>>, vector<1x4x256xf32>
    %1 = vector.shape_cast %0 : vector<1x4x256xf32> to vector<4x256xf32>
    %c0_2 = arith.constant 0 : index
    %c0_3 = arith.constant 0 : index
    %c0_4 = arith.constant 0 : index
    %2 = vector.load %arg3[%c0_2, %c0_3, %c0_4] : memref<1x1x256xi32, #tpu.memory_space<vmem>>, vector<1x1x256xi32>
    %3 = vector.shape_cast %2 : vector<1x1x256xi32> to vector<1x256xi32>
    %cst = arith.constant dense<0xFF800000> : vector<256xf32>
    %4 = vector.multi_reduction <maximumf>, %1, %cst [0] : vector<4x256xf32> to vector<256xf32>
    %5 = vector.shape_cast %4 : vector<256xf32> to vector<1x256xf32>
    %6 = vector.broadcast %5 : vector<1x256xf32> to vector<4x256xf32>
    %7 = arith.subf %1, %6 : vector<4x256xf32>
    %8 = math.exp %7 : vector<4x256xf32>
    %cst_5 = arith.constant dense<0.000000e+00> : vector<256xf32>
    %9 = vector.multi_reduction <add>, %8, %cst_5 [0] : vector<4x256xf32> to vector<256xf32>
    %10 = vector.shape_cast %9 : vector<256xf32> to vector<1x256xf32>
    %11 = math.log %10 : vector<1x256xf32>
    %12 = arith.addf %11, %5 : vector<1x256xf32>
    %13 = vector.broadcast %12 : vector<1x256xf32> to vector<4x256xf32>
    %14 = arith.subf %1, %13 : vector<4x256xf32>
    %15 = tpu.iota {dimensions = array<i32: 0>} : vector<4x256xi32>
    %16 = vector.broadcast %3 : vector<1x256xi32> to vector<4x256xi32>
    %17 = arith.cmpi eq, %15, %16 : vector<4x256xi32>
    %cst_6 = arith.constant 0.000000e+00 : f32
    %18 = vector.broadcast %cst_6 : f32 to vector<4x256xf32>
    %19 = arith.select %17, %14, %18 : vector<4x256xi1>, vector<4x256xf32>
    %cst_7 = arith.constant dense<0.000000e+00> : vector<256xf32>
    %20 = vector.multi_reduction <add>, %19, %cst_7 [0] : vector<4x256xf32> to vector<256xf32>
    %21 = vector.shape_cast %20 : vector<256xf32> to vector<1x256xf32>
    %22 = math.exp %21 : vector<1x256xf32>
    %cst_8 = arith.constant 1.000000e+00 : f32
    %23 = vector.broadcast %cst_8 : f32 to vector<1x256xf32>
    %24 = arith.subf %23, %22 : vector<1x256xf32>
    %25 = arith.mulf %24, %24 : vector<1x256xf32>
    %cst_9 = arith.constant 0.000000e+00 : f32
    %26 = vector.broadcast %cst_9 : f32 to vector<1x256xf32>
    %27 = arith.subf %26, %25 : vector<1x256xf32>
    %28 = arith.mulf %27, %21 : vector<1x256xf32>
    %29 = vector.shape_cast %28 : vector<1x256xf32> to vector<1x1x256xf32>
    %cst_10 = arith.constant dense<0.000000e+00> : vector<1xf32>
    %30 = vector.multi_reduction <add>, %29, %cst_10 [1, 2] : vector<1x1x256xf32> to vector<1xf32>
    %31 = vector.shape_cast %30 : vector<1xf32> to vector<1x1x1xf32>
    %32 = vector.extract %31[0, 0, 0] : f32 from vector<1x1x1xf32>
    %33 = vector.broadcast %32 : f32 to vector<1x128xf32>
    %c0_11 = arith.constant 0 : index
    %c0_12 = arith.constant 0 : index
    %34 = vector.load %arg4[%c0_11, %c0_12] : memref<1x128xf32, #tpu.memory_space<vmem>>, vector<1x128xf32>
    tpu.vector_store %arg4[%c0_11, %c0_12], %33 {strides = array<i32>} : memref<1x128xf32, #tpu.memory_space<vmem>>, vector<1x128xf32>,
    return
  }
  func.func @transform_0(%arg0: i32, %arg1: i32) -> (i32, i32, i32) {
    %c0_i32 = arith.constant 0 : i32
    %c0_i32_0 = arith.constant 0 : i32
    return %arg0, %c0_i32, %arg1 : i32, i32, i32
  }
  func.func @transform_1(%arg0: i32, %arg1: i32) -> (i32, i32, i32) {
    %c0_i32 = arith.constant 0 : i32
    %c0_i32_0 = arith.constant 0 : i32
    return %arg0, %c0_i32, %arg1 : i32, i32, i32
  }
  func.func @transform_2(%arg0: i32, %arg1: i32) -> (i32, i32) {
    %c1_i32 = arith.constant 1 : i32
    %0 = arith.muli %arg0, %c1_i32 : i32
    %1 = arith.addi %0, %arg1 : i32
    %c0_i32 = arith.constant 0 : i32
    %c0_i32_0 = arith.constant 0 : i32
    return %c0_i32, %1 : i32, i32
  }
}

</mosaic_0001>

<bundles_post_ra>
// kernel: tpu_custom_call.1
= control target key start
LH: loop header
LB: loop body
LE: loop exit
PB: predicated region body
PF: predicated region fallthrough
CT: control target
= control target key end

     0   :  { %7 = vsyncpa [#allocation3], 0  ;;  %s867_s0 = inlined_call_operand.hbm [shape: f32[2,4,256], index: 0, kind: input, shape index: {}]   ;;  %s868_s1 = inlined_call_operand.hbm [shape: s32[2,1,256], index: 1, kind: input, shape index: {}]   ;;  %s869_s2 = inlined_call_operand.hbm [shape: f32[1,256], index: 2, kind: output, shape index: {}]  }
   0x1   :  { %9 = vsyncpa [#allocation3 + $0x1], 0 }
   0x2   :  { %10 = vsyncpa [#allocation6], 0 }
   0x3   :  { %12 = vsyncpa [#allocation6 + $0x1], 0 }
   0x4   :  { %13 = vsyncpa [#allocation4], 0 }
   0x5   :  { %15 = vsyncpa [#allocation4 + $0x1], 0  ;;  %s717_s9 = smov 0   ;;  %s719_s10 = smov 0  }
   0x6   :  { %s721_s11 = smov 0   ;;  %s723_s12 = smov 0  }
   0x7   :  { %s725_s13 = smov 0   ;;  %s727_s14 = smov 0  }
   0x8 LB: > { %s460_s15 = sadd.s32 4294967295, %s700_s14   ;;  %s461_s16 = sadd.s32 4294967294, %s700_s14   ;;  %s700_s14 = sphi %s727_s14, %s21_s14   ;;  %s696_s13 = sphi %s725_s13, %s879_s13   ;;  %s692_s12 = sphi %s723_s12, %s878_s12   ;;  %s688_s11 = sphi %s721_s11, %s877_s11   ;;  %s684_s10 = sphi %s719_s10, %s876_s10   ;;  %s680_s9 = sphi %s717_s9, %s875_s9  }
   0x9   : > { %s33_s17 = sadd.s32 1, %s696_s13  ;;  %s42_s18 = sadd.s32 1, %s688_s11 }
   0xa   : > { %p35_p0 = scmp.ge.s32.totalorder %s33_s17, 2  ;;  %p49_p1 = scmp.ne.s32.totalorder %s688_s11, %s684_s10 }
   0xb   : > { %p50_p2 = scmp.eq.s32.totalorder %s700_s14, 0  ;;  %p55_p3 = scmp.ne.s32.totalorder %s684_s10, %s680_s9 }
   0xc   : > { %s881_s17 = smov (%p35_p0, %s33_s17), 0  ;;  %p56_p5 = scmp.eq.s32.totalorder %s460_s15, 0 }
   0xd   : > { %p758_p4 = por %p50_p2, %p49_p1  ;;  %s37_s20 = ssub.s32 %s696_s13, %s881_s17 }
   0xe   : > { %p109_p6 = scmp.eq.s32.totalorder %s460_s15, 1  ;;  %p40_p7 = scmp.eq.s32.totalorder %s37_s20, 0 }
   0xf   : > { %p764_p8 = por %p56_p5, %p55_p3  ;;  %p115_p10 = scmp.eq.s32.totalorder %s461_s16, 1 }
  0x10   : > { %p768_p9 = por %p109_p6, %p49_p1  ;;  %p463_p12 = scmp.ge.s32.totalorder %s700_s14, 2 }
  0x11   : > { %s773_s23 = scalar_select %p40_p7, %s688_s11, %s42_s18  }
  0x12   : > { %p775_p11 = por %p115_p10, %p55_p3  ;;  %p494_p13 = scmp.lt.s32.totalorder %s700_s14, 2 }
  0x13   : > { %s135_s25 = sand.u32 1, %s688_s11   ;;  %s474_s27 = sshll.u32 %s696_s13, 3 }
  0x14   : > { %s464_s26 = sshll.u32 %s135_s25, 3  ;;  %s146_s30 = scalar_lea.hbm %s867_s0, %s474_s27 }
  0x15   : > { %s139_s3 = scalar_lea.vmem [#allocation2], %s464_s26  ;;  %s148_s5 = sshll.u32 %s146_s30, 4  ;;  %s149_s5 = int_to_ptr.hbm [resolvable:$true] %s148_s5 }
  0x16   : > { %s150_s4 = sshll.u32 %s139_s3, 4  ;;  %p788_p0 = pnand %p494_p13, %p758_p4  ;;  %s151_s4 = int_to_ptr.vmem [resolvable:$true] %s150_s4 }
  0x17   : > { %p469_p1 = scmp.ge.s32.totalorder %s700_s14, 1  ;;  %p176_p2 = scmp.lt.s32.totalorder %s700_s14, 3 }
  0x18   : > { %s136_s7 = scalar_lea.sflag [#allocation3], %s135_s25  ;;  %s467_s8 = sshll.u32 %s135_s25, 1 }
  0x19   : > { %486 = dma.hbm_to_vmem [thread:$0]  (!%p788_p0), %s149_s5, 128, %s151_s4, %s136_s7  }
  0x1a   : > { %p177_p3 = pnand %p469_p1, %p176_p2  ;;  %s468_s15 = sshll.u32 %s696_s13, 1 }
  0x1b   : > { %s167_s20 = scalar_lea.hbm %s868_s1, %s468_s15  ;;  %s161_s26 = scalar_lea.vmem [#allocation5], %s467_s8 }
  0x1c   : > { %s171_s19 = sshll.u32 %s161_s26, 4  ;;  %s169_s27 = sshll.u32 %s167_s20, 4  ;;  %s172_s19 = int_to_ptr.vmem [resolvable:$true] %s171_s19  ;;  %s170_s27 = int_to_ptr.hbm [resolvable:$true] %s169_s27 }
  0x1d   : > { %s158_s28 = scalar_lea.sflag [#allocation6], %s135_s25  ;;  %180 = sbr.rel (%p177_p3) target bundleno = 337 (0x151), region = 28 }
  0x1e   : > { %489 = dma.hbm_to_vmem [thread:$0]  (!%p788_p0), %s170_s27, 32, %s172_s19, %s158_s28  }
  0x1f   : > { %s803_s29 = sand.u32 (!%p177_p3), 1, %s684_s10  }
  0x20   : > { %s470_s30 = sshll.u32 (!%p177_p3), %s803_s29, 3  ;;  %s183_s3 = scalar_lea.sflag (!%p177_p3), [#allocation3], %s803_s29 }
  0x21   : > { %s186_s4 = scalar_lea.vmem (!%p177_p3), [#allocation2], %s470_s30 }
  0x22   : > { %667 = dma.done.wait (%p764_p8), %s183_s3, 128  }
  0x23   : > { %669 = vsyncadd (%p764_p8), %s183_s3, 4294967168  ;;  %s471_s25 = sshll.u32 %s803_s29, 1  ;;  %s193_s5 = scalar_lea.sflag [#allocation6], %s803_s29 }
  0x24   : > { %s813_s6 = scalar_lea.vmem [#allocation5], %s471_s25 }
  0x25   : > { %671 = dma.done.wait (%p764_p8), %s193_s5, 32  }
  0x26   : > { %673 = vsyncadd (%p764_p8), %s193_s5, 4294967264  ;;  %v225_v0 = vld [vmem:[%s186_s4] sm:$0xff]  ;;  %vm233_vm0 = vcmask 1043456   ;;  %v288_v46 = vlaneseq  ;;  %v226_v47 = vld [vmem:[%s813_s6] sm:$0x3]  ;;  %vm328_vm3 = vcmask 1040384   ;;  %s353_s8 = scalar_lea.hbm %s869_s2, %s692_s12 }
  0x27   : > { %228 = vst [vmem:[#allocation1] ss:$2 sm:$0xff] %v225_v0  ;;  %v290_v50 = vperm.slane %v226_v47, 0  ;;  %v291_v51 = vperm.slane %v226_v47, 1  ;;  %s221_s15 = scalar_lea.vmem [#allocation7], %s803_s29  ;;  %s357_s18 = sshll.u32 %s353_s8, 4  ;;  %s358_s18 = int_to_ptr.hbm [resolvable:$true] %s357_s18 }
  0x28   : > { %v289_v49 = vshrl.u32 %v288_v46, 7  ;;  %s355_s16 = sshll.u32 %s221_s15, 4  ;;  %s344_s26 = scalar_lea.sflag [#allocation4], %s803_s29  ;;  %s356_s16 = int_to_ptr.vmem [resolvable:$true] %s355_s16 }
  0x29   : > { %s628_s19 = sshra.s32 %s358_s18, 4  ;;  %s634_s12 = scalar_lea.hbm %s869_s2, 2  ;;  %s629_s19 = int_to_ptr.hbm [resolvable:$true] %s628_s19 }
  0x2a   : > { %vm292_vm1 = vcmp.eq.s32.totalorder %v289_v49, %v290_v50  ;;  %vm293_vm2 = vcmp.eq.s32.totalorder %v289_v49, %v291_v51  ;;  %s630_s27 = scalar_lea.hbm %s629_s19, 1  ;;  %p635_p7 = scmp.lt.s32.totalorder %s629_s19, %s869_s2 }
  0x2b   : > { %p631_p4 = scmp.ne.s32.totalorder %s629_s19, %s630_s27  ;;  %p636_p8 = scmp.lt.s32.totalorder %s634_s12, %s630_s27 }
  0x2d   : > { %p632_p5 = pnand %p631_p4, %p768_p9  ;;  %p637_p10 = por %p636_p8, %p635_p7 }
  0x2e   : > { %v229_v1 = vld.sshfl [vmem:[#allocation1] sm:$0xff pattern:$0x75316420]  ;;  %v230_v2 = vld.sshfl [vmem:[#allocation1 + $0x8] sm:$0xff pattern:$0x75316420] }
  0x2f   : > { %v234_v3 = vsel %vm233_vm0, %v229_v1, -inf  ;;  %v241_v4 = vsel %vm233_vm0, %v230_v2, -inf  ;;  %p633_p6 = pneg %p632_p5 }
  0x30   : > { %v235_v5 = vrot.slane %v234_v3, 4  ;;  %v242_v6 = vrot.slane %v241_v4, 4 }
  0x31   : > { %p638_p13 = pnand %p637_p10, %p633_p6 }
  0x32   : > { %v236_v7 = vmax.f32 %v234_v3, %v235_v5  ;;  %v243_v8 = vmax.f32 %v241_v4, %v242_v6 }
  0x34   : > { %v237_v9 = vrot.slane %v236_v7, 2  ;;  %v244_v10 = vrot.slane %v243_v8, 2 }
  0x36   : > { %v238_v11 = vmax.f32 %v236_v7, %v237_v9  ;;  %v245_v12 = vmax.f32 %v243_v8, %v244_v10 }
  0x38   : > { %v239_v13 = vrot.slane %v238_v11, 1  ;;  %v246_v14 = vrot.slane %v245_v12, 1 }
  0x3a   : > { %v240_v15 = vmax.f32 %v238_v11, %v239_v13  ;;  %v247_v16 = vmax.f32 %v245_v12, %v246_v14 }
  0x3c   : > { %v250_v17 = vrot.slane %v247_v16, 4 }
  0x3e   : > { %v251_v18 = vsel %vm233_vm0, %v240_v15, %v250_v17 }
  0x3f   : > { %v253_v19 = vsub.f32 %v225_v0, %v251_v18 }
  0x41   : > { %v254_v20 = vmul.f32 1.442695, %v253_v19 }
  0x43   : > { %544 = vpow2.f32 %v254_v20 }
  0x49   : > { %v545_v21 = vpop.eup %544 }
  0x4a   : > { %257 = vst [vmem:[#allocation1] ss:$2 sm:$0xff] %v545_v21 }
  0x51   : > { %v258_v22 = vld.sshfl [vmem:[#allocation1] sm:$0xff pattern:$0x75316420]  ;;  %v259_v23 = vld.sshfl [vmem:[#allocation1 + $0x8] sm:$0xff pattern:$0x75316420] }
  0x52   : > { %v262_v24 = vsel %vm233_vm0, %v258_v22, 0.0  ;;  %v269_v25 = vsel %vm233_vm0, %v259_v23, 0.0 }
  0x53   : > { %v263_v26 = vrot.slane %v262_v24, 4  ;;  %v270_v27 = vrot.slane %v269_v25, 4 }
  0x55   : > { %v264_v28 = vadd.f32 %v263_v26, %v262_v24  ;;  %v271_v29 = vadd.f32 %v270_v27, %v269_v25 }
  0x57   : > { %v265_v30 = vrot.slane %v264_v28, 2  ;;  %v272_v31 = vrot.slane %v271_v29, 2 }
  0x59   : > { %v266_v32 = vadd.f32 %v265_v30, %v264_v28  ;;  %v273_v33 = vadd.f32 %v272_v31, %v271_v29 }
  0x5b   : > { %v267_v34 = vrot.slane %v266_v32, 1  ;;  %v274_v35 = vrot.slane %v273_v33, 1 }
  0x5d   : > { %v268_v36 = vadd.f32 %v267_v34, %v266_v32  ;;  %v275_v37 = vadd.f32 %v274_v35, %v273_v33 }
  0x5f   : > { %546 = vlog2.f32 %v268_v36 }
  0x60   : > { %548 = vlog2.f32 %v275_v37 }
  0x65   : > { %v547_v38 = vpop.eup %546 }
  0x66   : > { %v549_v39 = vpop.eup %548  ;;  %v277_v40 = vmul.f32 0.6931472, %v547_v38 }
  0x67   : > { %v279_v41 = vmul.f32 0.6931472, %v549_v39 }
  0x68   : > { %v280_v42 = vadd.f32 %v277_v40, %v240_v15 }
  0x69   : > { %v281_v43 = vadd.f32 %v279_v41, %v247_v16 }
  0x6b   : > { %v284_v44 = vrot.slane %v281_v43, 4 }
  0x6d   : > { %v285_v45 = vsel %vm233_vm0, %v280_v42, %v284_v44 }
  0x6e   : > { %v287_v48 = vsub.f32 %v225_v0, %v285_v45 }
  0x70   : > { %295 = vst [vmem:[#allocation1] ss:$2 sm:$0xff] %v287_v48 }
  0x77   : > { %v296_v52 = vld.sshfl [vmem:[#allocation1] sm:$0xff pattern:$0x75316420]  ;;  %v297_v53 = vld.sshfl [vmem:[#allocation1 + $0x8] sm:$0xff pattern:$0x75316420] }
  0x78   : > { %v300_v54 = vsel %vm292_vm1, %v296_v52, 0.0  ;;  %v301_v55 = vsel %vm293_vm2, %v297_v53, 0.0 }
  0x79   : > { %v302_v56 = vsel %vm233_vm0, %v300_v54, 0.0  ;;  %v309_v57 = vsel %vm233_vm0, %v301_v55, 0.0 }
  0x7a   : > { %v303_v58 = vrot.slane %v302_v56, 4  ;;  %v310_v59 = vrot.slane %v309_v57, 4 }
  0x7c   : > { %v304_v60 = vadd.f32 %v303_v58, %v302_v56  ;;  %v311_v61 = vadd.f32 %v310_v59, %v309_v57 }
  0x7e   : > { %v305_v62 = vrot.slane %v304_v60, 2  ;;  %v312_v63 = vrot.slane %v311_v61, 2 }
  0x80   : > { %v306_v0 = vadd.f32 %v305_v62, %v304_v60  ;;  %v313_v1 = vadd.f32 %v312_v63, %v311_v61 }
  0x82   : > { %v307_v2 = vrot.slane %v306_v0, 1  ;;  %v314_v3 = vrot.slane %v313_v1, 1 }
  0x84   : > { %v308_v4 = vadd.f32 %v307_v2, %v306_v0  ;;  %v315_v5 = vadd.f32 %v314_v3, %v313_v1 }
  0x86   : > { %v316_v6 = vmul.f32 1.442695, %v308_v4  ;;  %v318_v7 = vmul.f32 1.442695, %v315_v5 }
  0x88   : > { %550 = vpow2.f32 %v316_v6 }
  0x89   : > { %552 = vpow2.f32 %v318_v7 }
  0x8e   : > { %v551_v8 = vpop.eup %550 }
  0x8f   : > { %v553_v9 = vpop.eup %552  ;;  %v320_v10 = vsub.f32 1.0, %v551_v8 }
  0x90   : > { %v321_v11 = vsub.f32 1.0, %v553_v9 }
  0x91   : > { %v322_v12 = vmul.f32 %v320_v10, %v320_v10 }
  0x92   : > { %v323_v13 = vmul.f32 %v321_v11, %v321_v11 }
  0x93   : > { %v324_v14 = vsub.f32 0.0, %v322_v12 }
  0x94   : > { %v325_v15 = vsub.f32 0.0, %v323_v13 }
  0x95   : > { %v326_v16 = vmul.f32 %v324_v14, %v308_v4 }
  0x96   : > { %v327_v17 = vmul.f32 %v325_v15, %v315_v5 }
  0x97   : > { %v329_v18 = vsel %vm328_vm3, %v326_v16, 0.0 }
  0x98   : > { %v330_v19 = vsel %vm328_vm3, %v327_v17, 0.0 }
  0x99   : > { %v331_v20 = vadd.f32 %v330_v19, %v329_v18 }
  0x9b   : > { %332 = vadd.xlane.f32.xlu0 %v331_v20 }
 0x10e   : > { %v333_v21 = vpop.xlane.xlu0 %332 }
 0x10f   : > { %v334_v22 = vrot.slane %v333_v21, 4 }
 0x111   : > { %v335_v23 = vadd.f32 %v334_v22, %v333_v21 }
 0x113   : > { %v336_v24 = vrot.slane %v335_v23, 2 }
 0x115   : > { %v337_v25 = vadd.f32 %v336_v24, %v335_v23 }
 0x117   : > { %v338_v26 = vrot.slane %v337_v25, 1 }
 0x119   : > { %v339_v27 = vadd.f32 %v338_v26, %v337_v25 }
 0x11b   : > { %475 = vpush %v339_v27 }
 0x14c   : > { %s476_s20 = spop %475 }
 0x14d   : > { %v341_v28 = vstv %s476_s20 }
 0x14e   : > { %342 = vst [vmem:[%s221_s15] sm:$0x1] %v341_v28 }
 0x14f   : > { %641 = shalt.err (!%p638_p13)
}
 0x150   : > { %481 = dma.vmem_to_hbm [thread:$0]  (%p768_p9), %s356_s16, 16, %s358_s18, %s344_s26  }
 0x151 PF: > { %s369_s29 = sand.u32 1, %s680_s9   ;;  %p491_p0 = pnand %p463_p12, %p775_p11 }
 0x152   : > { %s370_s25 = scalar_lea.sflag [#allocation4], %s369_s29 }
 0x153   : > { %p492_p1 = pneg %p491_p0 }
 0x155   : > { %675 = dma.done.wait (%p492_p1), %s370_s25, 16  }
 0x156   : > { %677 = vsyncadd (%p492_p1), %s370_s25, 4294967280  ;;  %s21_s14 = sadd.s32 1, %s700_s14   ;;  %s875_s9 = smov %s684_s10 }
 0x157   : > { %p18_p2 = scmp.ge.s32.totalorder %s21_s14, 4   ;;  %s876_s10 = smov %s688_s11 }
 0x158   : > { %s877_s11 = smov %s773_s23  ;;  %s878_s12 = smov %s696_s13 }
 0x159   : > { %s879_s13 = smov %s881_s17  ;;  %20 = sbr.rel (!%p18_p2) target bundleno = 8 (0x8), region = 86 }
 0x15e   :  { %375 = vsyncpa [#allocation3], 1 }
 0x15f   :  { %377 = vsyncpa [#allocation3 + $0x1], 1 }
 0x160   :  { %378 = vsyncpa [#allocation6], 1 }
 0x161   :  { %380 = vsyncpa [#allocation6 + $0x1], 1 }
 0x162   :  { %381 = vsyncpa [#allocation4], 1 }
 0x163   :  { %383 = vsyncpa [#allocation4 + $0x1], 1 }

</bundles_post_ra>
